<compile_context>
chip_gen: v6e
topology: v6e:2x2x1
jax: 0.10.0
libtpu: 0.0.40
codegen_flags: <defaults>
</compile_context>

<pallas_src>
import functools

import jax
import jax.numpy as jnp
from jax.experimental import pallas as pl
from jax.experimental.pallas import tpu as pltpu


def _round_up(x: int, m: int) -> int:
    return (x + m - 1) // m * m


def qnet_kernel(x_ref, w1_ref, b1_ref, w2_ref, b2_ref, o_ref):
    # Cast x to the MXU compute dtype in-kernel (free VPU slots, no extra HBM pass).
    x = x_ref[...].astype(w1_ref.dtype)
    # fc1 on the MXU, f32 accumulation.
    h = jnp.dot(x, w1_ref[...], preferred_element_type=jnp.float32)
    # Bias + ReLU in f32 on the VPU (v5e has no bf16 VPU path).
    h = jnp.maximum(h + b1_ref[...], 0.0)
    # fc2 on the MXU (LHS cast to the weight dtype, acc stays f32).
    out = jnp.dot(h.astype(w2_ref.dtype), w2_ref[...],
                  preferred_element_type=jnp.float32)
    # Store directly in the output dtype (halves writeback for bf16 outputs,
    # avoids a post-kernel cast pass).
    o_ref[...] = (out + b2_ref[...]).astype(o_ref.dtype)


def prepare_params(w1, b1, w2, b2, *, compute_dtype=jnp.bfloat16):
    """One-time padding/casting of QNetwork params (hoisted out of the hot path).

    w1: [input_size, hidden_size]  (pre-transposed vs. torch nn.Linear)
    b1: [hidden_size] or [1, hidden_size]
    w2: [hidden_size, num_actions] (pre-transposed vs. torch nn.Linear)
    b2: [num_actions] or [1, num_actions]
    Returns (w1p, b1p, w2p, b2p) ready for qnetwork_forward.
    """
    IN, HID = w1.shape
    ACT = w2.shape[1]

    # Lane-dense hidden dim; 256-align when >128 for v6e/v7x 256-wide MXU.
    HID_P = _round_up(HID, 128)
    if HID_P > 128:
        HID_P = _round_up(HID_P, 256)

    # Zero-padded hidden columns/rows contribute exactly 0 to the output, so
    # semantics match nn.Linear. Actions stay UNPADDED (full-dim output block).
    w1p = jnp.pad(w1, ((0, 0), (0, HID_P - HID))).astype(compute_dtype)
    b1p = jnp.pad(b1.reshape(1, -1), ((0, 0), (0, HID_P - HID))).astype(jnp.float32)
    w2p = jnp.pad(w2, ((0, HID_P - HID), (0, 0))).astype(compute_dtype)
    b2p = b2.reshape(1, -1).astype(jnp.float32)
    return w1p, b1p, w2p, b2p


@functools.partial(jax.jit, static_argnames=("block_b", "allow_small_fallback"))
def qnetwork_forward(x, w1p, b1p, w2p, b2p, *, block_b=512,
                     allow_small_fallback=False):
    """Fused 2-layer MLP (QNetwork.forward) on pre-padded params.

    x : [B, input_size] (any float dtype; cast to w1p.dtype inside the kernel)
    returns [B, num_actions] in x.dtype
    """
    B, IN = x.shape
    assert w1p.shape[0] == IN
    HID_P = w1p.shape[1]
    ACT = w2p.shape[1]
    out_dtype = x.dtype

    # ---- balanced batch tiling -------------------------------------------
    B8 = _round_up(B, 8)
    n_tiles = max(1, pl.cdiv(B8, block_b))
    if B8 >= 16:
        n_tiles = max(n_tiles, 2)      # v7x: shard "parallel" axis over 2 TCs
    if B8 >= 768:
        n_tiles = max(n_tiles, 3)      # v5e/v6e: >=3 steps to hide x/out DMAs
    TB = _round_up(pl.cdiv(B8, n_tiles), 8)
    n_tiles = pl.cdiv(B8, TB)
    B_P = TB * n_tiles

    # ---- tiny-problem fallback (opt-in): grid==1 is pure launch overhead ---
    flops = 2 * B_P * (IN * HID_P + HID_P * ACT)
    if allow_small_fallback and n_tiles == 1 and flops < (1 << 22):
        h = jnp.maximum(
            jnp.dot(x.astype(w1p.dtype), w1p,
                    preferred_element_type=jnp.float32) + b1p, 0.0)
        out = jnp.dot(h.astype(w2p.dtype), w2p,
                      preferred_element_type=jnp.float32) + b2p
        return out.astype(out_dtype)

    # Batch padding only (kept in x's native dtype; kernel does the cast).
    xp = x if B_P == B else jnp.pad(x, ((0, B_P - B), (0, 0)))

    x_item = jnp.dtype(x.dtype).itemsize
    w_item = jnp.dtype(w1p.dtype).itemsize
    o_item = jnp.dtype(out_dtype).itemsize

    # ---- explicit VMEM budget (v5e 16 MiB default scope / v7x 64 MiB phys) --
    resident = (IN * HID_P + HID_P * ACT) * w_item + (HID_P + ACT) * 4
    per_step = 2 * TB * IN * x_item + 2 * TB * ACT * o_item    # double-buffered
    hidden = 2 * TB * HID_P * 4                                 # f32 hidden + slack
    vmem_limit = int(min(max(2 * (resident + per_step + hidden), 32 << 20),
                         64 << 20))

    cost = pl.CostEstimate(
        flops=flops,
        transcendentals=0,
        bytes_accessed=int(B_P * IN * x_item + resident + B_P * ACT * o_item),
    )

    out_padded = pl.pallas_call(
        qnet_kernel,
        out_shape=jax.ShapeDtypeStruct((B_P, ACT), out_dtype),
        grid=(n_tiles,),
        in_specs=[
            pl.BlockSpec((TB, IN), lambda i: (i, 0)),       # x: batch-tiled
            pl.BlockSpec((IN, HID_P), lambda i: (0, 0)),    # w1: VMEM-resident
            pl.BlockSpec((1, HID_P), lambda i: (0, 0)),     # b1: VMEM-resident
            pl.BlockSpec((HID_P, ACT), lambda i: (0, 0)),   # w2: VMEM-resident
            pl.BlockSpec((1, ACT), lambda i: (0, 0)),       # b2: VMEM-resident
        ],
        out_specs=pl.BlockSpec((TB, ACT), lambda i: (i, 0)),
        compiler_params=pltpu.CompilerParams(
            dimension_semantics=("parallel",),
            vmem_limit_bytes=vmem_limit),
        cost_estimate=cost,
    )(xp, w1p, b1p, w2p, b2p)

    # Strip batch padding outside the kernel (cheap XLA slice).
    return out_padded[:B]


def init_params(key, input_size, hidden_size, num_actions, dtype=jnp.float32):
    # Mimics nn.Linear's U(-1/sqrt(fan_in), 1/sqrt(fan_in)); weights stored
    # pre-transposed relative to PyTorch's (out_features, in_features).
    k1, k2, k3, k4 = jax.random.split(key, 4)
    lim1 = 1.0 / jnp.sqrt(jnp.float32(input_size))
    lim2 = 1.0 / jnp.sqrt(jnp.float32(hidden_size))
    w1 = jax.random.uniform(k1, (input_size, hidden_size), dtype, -lim1, lim1)
    b1 = jax.random.uniform(k2, (1, hidden_size), dtype, -lim1, lim1)
    w2 = jax.random.uniform(k3, (hidden_size, num_actions), dtype, -lim2, lim2)
    b2 = jax.random.uniform(k4, (1, num_actions), dtype, -lim2, lim2)
    return w1, b1, w2, b2


if __name__ == "__main__":
    input_size, hidden_size, num_actions = 32, 64, 8
    batch = 8

    key = jax.random.PRNGKey(0)
    k_x, k_p = jax.random.split(key)
    x = jax.random.normal(k_x, (batch, input_size), jnp.float32)
    w1, b1, w2, b2 = init_params(k_p, input_size, hidden_size, num_actions)

    # Reference in plain JAX (f32).
    ref = jnp.maximum(x @ w1 + b1, 0.0) @ w2 + b2

    # bf16 MXU path (params padded/cast exactly once, outside the hot loop).
    params_bf16 = prepare_params(w1, b1, w2, b2, compute_dtype=jnp.bfloat16)
    out = jax.block_until_ready(qnetwork_forward(x, *params_bf16))
    assert out.shape == (batch, num_actions)
    assert jnp.allclose(out, ref, atol=5e-2, rtol=5e-2), (
        float(jnp.max(jnp.abs(out - ref))))

    # Exact-path sanity check in f32 (no bf16 rounding).
    params_f32 = prepare_params(w1, b1, w2, b2, compute_dtype=jnp.float32)
    out_f32 = jax.block_until_ready(qnetwork_forward(x, *params_f32))
    assert jnp.allclose(out_f32, ref, atol=1e-5, rtol=1e-5)

    # Opt-in tiny-problem fallback path matches semantics too.
    out_fb = jax.block_until_ready(
        qnetwork_forward(x, *params_f32, allow_small_fallback=True))
    assert jnp.allclose(out_fb, ref, atol=1e-5, rtol=1e-5)

    # Multi-step grid + batch padding path (balanced tiling, 3 grid steps).
    xb = jax.random.normal(k_x, (40, input_size), jnp.float32)
    refb = jnp.maximum(xb @ w1 + b1, 0.0) @ w2 + b2
    outb = jax.block_until_ready(
        qnetwork_forward(xb, *params_bf16, block_b=16))
    assert outb.shape == (40, num_actions)
    assert jnp.allclose(outb, refb, atol=5e-2, rtol=5e-2)

    print("KERNEL_OK")
</pallas_src>

<mosaic_0001>
module attributes {stable_mosaic.version = 11 : i64} {
  func.func @qnet_kernel(%arg0: i32, %arg1: memref<8x32xf32, #tpu.memory_space<vmem>>, %arg2: memref<32x128xbf16, #tpu.memory_space<vmem>>, %arg3: memref<1x128xf32, #tpu.memory_space<vmem>>, %arg4: memref<128x8xbf16, #tpu.memory_space<vmem>>, %arg5: memref<1x8xf32, #tpu.memory_space<vmem>>, %arg6: memref<8x8xf32, #tpu.memory_space<vmem>>) attributes {dimension_semantics = [#tpu.dimension_semantics<parallel>], iteration_bounds = array<i64: 1>, scalar_prefetch = 0 : i64, scratch_operands = 0 : i64, tpu.core_type = #tpu.core_type<tc>, window_params = [{transform_indices = @transform_0, window_bounds = array<i64: 8, 32>}, {pipeline_mode = #tpu.pipeline_mode<synchronous>, transform_indices = @transform_1, window_bounds = array<i64: 32, 128>}, {pipeline_mode = #tpu.pipeline_mode<synchronous>, transform_indices = @transform_2, window_bounds = array<i64: 1, 128>}, {pipeline_mode = #tpu.pipeline_mode<synchronous>, transform_indices = @transform_3, window_bounds = array<i64: 128, 8>}, {pipeline_mode = #tpu.pipeline_mode<synchronous>, transform_indices = @transform_4, window_bounds = array<i64: 1, 8>}, {transform_indices = @transform_5, window_bounds = array<i64: 8, 8>}]} {
    %c0 = arith.constant 0 : index
    %c0_0 = arith.constant 0 : index
    %0 = vector.load %arg1[%c0, %c0_0] : memref<8x32xf32, #tpu.memory_space<vmem>>, vector<8x32xf32>
    %1 = arith.truncf %0 : vector<8x32xf32> to vector<8x32xbf16>
    %c0_1 = arith.constant 0 : index
    %c0_2 = arith.constant 0 : index
    %2 = vector.load %arg2[%c0_1, %c0_2] : memref<32x128xbf16, #tpu.memory_space<vmem>>, vector<32x128xbf16>
    %cst = arith.constant dense<0.000000e+00> : vector<8x128xf32>
    %3 = tpu.matmul %1, %2, %cst {dimension_numbers = #tpu.dot_dimension_numbers<[1], [0], [0], [1], [0, 0, 1, 1], [], []>} : vector<8x32xbf16>, vector<32x128xbf16>, vector<8x128xf32> -> vector<8x128xf32>
    %c0_3 = arith.constant 0 : index
    %c0_4 = arith.constant 0 : index
    %4 = vector.load %arg3[%c0_3, %c0_4] : memref<1x128xf32, #tpu.memory_space<vmem>>, vector<1x128xf32>
    %5 = vector.broadcast %4 : vector<1x128xf32> to vector<8x128xf32>
    %6 = arith.addf %3, %5 : vector<8x128xf32>
    %cst_5 = arith.constant 0.000000e+00 : f32
    %7 = vector.broadcast %cst_5 : f32 to vector<8x128xf32>
    %8 = arith.maximumf %6, %7 : vector<8x128xf32>
    %9 = arith.truncf %8 : vector<8x128xf32> to vector<8x128xbf16>
    %c0_6 = arith.constant 0 : index
    %c0_7 = arith.constant 0 : index
    %10 = vector.load %arg4[%c0_6, %c0_7] : memref<128x8xbf16, #tpu.memory_space<vmem>>, vector<128x8xbf16>
    %cst_8 = arith.constant dense<0.000000e+00> : vector<8x8xf32>
    %11 = tpu.matmul %9, %10, %cst_8 {dimension_numbers = #tpu.dot_dimension_numbers<[1], [0], [0], [1], [0, 0, 1, 1], [], []>} : vector<8x128xbf16>, vector<128x8xbf16>, vector<8x8xf32> -> vector<8x8xf32>
    %c0_9 = arith.constant 0 : index
    %c0_10 = arith.constant 0 : index
    %12 = vector.load %arg5[%c0_9, %c0_10] : memref<1x8xf32, #tpu.memory_space<vmem>>, vector<1x8xf32>
    %13 = vector.broadcast %12 : vector<1x8xf32> to vector<8x8xf32>
    %14 = arith.addf %11, %13 : vector<8x8xf32>
    %c0_11 = arith.constant 0 : index
    %c0_12 = arith.constant 0 : index
    %15 = vector.load %arg6[%c0_11, %c0_12] : memref<8x8xf32, #tpu.memory_space<vmem>>, vector<8x8xf32>
    tpu.vector_store %arg6[%c0_11, %c0_12], %14 {strides = array<i32>} : memref<8x8xf32, #tpu.memory_space<vmem>>, vector<8x8xf32>,
    return
  }
  func.func @transform_0(%arg0: i32) -> (i32, i32) {
    %c0_i32 = arith.constant 0 : i32
    %c0_i32_0 = arith.constant 0 : i32
    return %arg0, %c0_i32 : i32, i32
  }
  func.func @transform_1(%arg0: i32) -> (i32, i32) {
    %c0_i32 = arith.constant 0 : i32
    %c0_i32_0 = arith.constant 0 : i32
    %c0_i32_1 = arith.constant 0 : i32
    return %c0_i32, %c0_i32_0 : i32, i32
  }
  func.func @transform_2(%arg0: i32) -> (i32, i32) {
    %c0_i32 = arith.constant 0 : i32
    %c0_i32_0 = arith.constant 0 : i32
    %c0_i32_1 = arith.constant 0 : i32
    return %c0_i32, %c0_i32_0 : i32, i32
  }
  func.func @transform_3(%arg0: i32) -> (i32, i32) {
    %c0_i32 = arith.constant 0 : i32
    %c0_i32_0 = arith.constant 0 : i32
    %c0_i32_1 = arith.constant 0 : i32
    return %c0_i32, %c0_i32_0 : i32, i32
  }
  func.func @transform_4(%arg0: i32) -> (i32, i32) {
    %c0_i32 = arith.constant 0 : i32
    %c0_i32_0 = arith.constant 0 : i32
    %c0_i32_1 = arith.constant 0 : i32
    return %c0_i32, %c0_i32_0 : i32, i32
  }
  func.func @transform_5(%arg0: i32) -> (i32, i32) {
    %c0_i32 = arith.constant 0 : i32
    %c0_i32_0 = arith.constant 0 : i32
    return %arg0, %c0_i32 : i32, i32
  }
}

</mosaic_0001>

<bundles_post_ra>
// kernel: qnetwork_forward.1
= control target key start
LH: loop header
LB: loop body
LE: loop exit
PB: predicated region body
PF: predicated region fallthrough
CT: control target
= control target key end

     0   :  { %v308_v1 = vmov 0.0   ;;  %vm309_vm0 = vmmov 0   ;;  %vm47_vm1 = vcmask 261120   ;;  %s383_s0 = inlined_call_operand.vmem [shape: f32[8,32], index: 0, kind: input, shape index: {}]   ;;  %s384_s1 = inlined_call_operand.vmem [shape: bf16[32,128], index: 1, kind: input, shape index: {}]   ;;  %s385_s2 = inlined_call_operand.vmem [shape: f32[1,128], index: 2, kind: input, shape index: {}]   ;;  %s386_s3 = inlined_call_operand.vmem [shape: bf16[128,8], index: 3, kind: input, shape index: {}]   ;;  %s387_s4 = inlined_call_operand.vmem [shape: f32[1,8], index: 4, kind: input, shape index: {}]   ;;  %s388_s5 = inlined_call_operand.hbm [shape: f32[8,8], index: 5, kind: output, shape index: {}]  }
   0x1   :  { %v276_v0 = vld [vmem:[%s384_s1 + $0x8] sm:$0xff]   ;;  %245 = vmatprep.subr.bf16.mxu0 %v308_v1  ;;  %v277_v2 = vld [vmem:[%s384_s1] sm:$0xff]   ;;  %253 = vmatprep.subr.bf16.mxu1 %v308_v1  ;;  %v278_v4 = vld [vmem:[%s386_s3 + $0x38] sm:$0xff]  }
   0x2   :  { %246 = vmatpush3.bf16.msra.mxu0 %v276_v0  ;;  %249 = vmatprep.mubr.msk.bf16.mxu0 %vm309_vm0, %v308_v1  ;;  %v22_v3 = vld [vmem:[%s383_s0] sm:$0xff]  ;;  %v279_v6 = vld [vmem:[%s386_s3 + $0x30] sm:$0xff]   ;;  %v280_v7 = vld [vmem:[%s386_s3 + $0x28] sm:$0xff]  }
   0x3   :  { %247 = vmatprep.subr.bf16.mxu0 %v308_v1  ;;  %269 = vmatprep.mubr.msk.bf16.mxu1 %vm309_vm0, %v308_v1  ;;  %v23_v5 = vpack.c.bf16 %v22_v3, %v22_v3 }
   0x4   :  { %254 = vmatpush3.bf16.msra.mxu1 %v278_v4 }
   0x5   :  { %255 = vmatprep.subr.bf16.mxu1 %v308_v1 }
   0x6   :  { %248 = vmatpush3.bf16.msra.mxu0 %v277_v2 }
   0x8   :  { %256 = vmatpush3.bf16.msra.mxu1 %v279_v6 }
   0x9   :  { %250 = vmatmul.mubr.msk.bf16.vlgmr.msra.gmra.mxu0 %vm47_vm1, %v23_v5  ;;  %257 = vmatprep.subr.bf16.mxu1 %v308_v1 }
   0xa   :  { %10 = vsyncpa [#allocation3], 0  ;;  %v281_v8 = vld [vmem:[%s386_s3 + $0x20] sm:$0xff]   ;;  %v282_v9 = vld [vmem:[%s386_s3 + $0x18] sm:$0xff]   ;;  %s310_s17 = smov [#allocation2]   ;;  %vm204_vm2 = vcmask 64512  }
   0xb   :  { %v283_v10 = vld [vmem:[%s386_s3 + $0x10] sm:$0xff]   ;;  %v284_v11 = vld [vmem:[%s386_s3 + $0x8] sm:$0xff]   ;;  %v285_v12 = vld [vmem:[%s386_s3] sm:$0xff]   ;;  %s212_s18 = sshll.u32 %s310_s17, 4  ;;  %s213_s18 = int_to_ptr.vmem [resolvable:$true] %s212_s18 }
   0xc   :  { %258 = vmatpush3.bf16.msra.mxu1 %v280_v7  ;;  %v220_v13 = vld [vmem:[%s385_s2] ss:$0 sm:$0xff]  ;;  %s286_s2 = scalar_lea.vmem %s213_s18, 128  ;;  %p291_p1 = scmp.lt.s32.totalorder %s213_s18, %s213_s18 }
   0xd   :  { %259 = vmatprep.subr.bf16.mxu1 %v308_v1  ;;  %v224_v21 = vld [vmem:[%s387_s4] ss:$0 sm:$0xff]  ;;  %p287_p0 = scmp.ne.s32.totalorder %s213_s18, %s286_s2  ;;  %p292_p2 = scmp.lt.s32.totalorder %s286_s2, %s286_s2 }
   0xf   :  { %p293_p3 = por %p292_p2, %p291_p1 }
  0x10   :  { %260 = vmatpush3.bf16.msra.mxu1 %v281_v8 }
  0x11   :  { %261 = vmatprep.subr.bf16.mxu1 %v308_v1  ;;  %p294_p4 = pnand %p293_p3, %p287_p0 }
  0x14   :  { %262 = vmatpush3.bf16.msra.mxu1 %v282_v9 }
  0x15   :  { %263 = vmatprep.subr.bf16.mxu1 %v308_v1 }
  0x18   :  { %264 = vmatpush3.bf16.msra.mxu1 %v283_v10 }
  0x19   :  { %265 = vmatprep.subr.bf16.mxu1 %v308_v1 }
  0x1c   :  { %266 = vmatpush3.bf16.msra.mxu1 %v284_v11 }
  0x1d   :  { %267 = vmatprep.subr.bf16.mxu1 %v308_v1 }
  0x20   :  { %268 = vmatpush3.bf16.msra.mxu1 %v285_v12 }
  0xc9   :  { %v85_v14 = vpop.f32.mrf.mxu0 }
  0xca   :  { %v86_v15 = vadd.f32 %v220_v13, %v85_v14 }
  0xcb   :  { %v251_v16 = vpop.f32.mrf.mxu0 }
  0xcc   :  { %v91_v17 = vmax.f32 %v86_v15, 0.0 }
  0xcd   :  { %v88_v18 = vpop.f32.mrf.mxu0 }
  0xce   :  { %v92_v19 = vpack.c.bf16 %v91_v17, %v91_v17 }
  0xcf   :  { %v252_v20 = vpop.f32.mrf.mxu0 }
  0xd0   :  { %270 = vmatmul.mubr.bf16.vlgmr.msra.gmra.mxu1 %v92_v19 }
 0x190   :  { %v198_v22 = vpop.f32.mrf.mxu1 }
 0x191   :  { %v199_v23 = vadd.f32 %v224_v21, %v198_v22 }
 0x192   :  { %v271_v24 = vpop.f32.mrf.mxu1 }
 0x193   :  { %205 = vst.msk [vmem:[#allocation2] sm:$0xff] %vm204_vm2, %v199_v23 }
 0x194   :  { %v201_v25 = vpop.f32.mrf.mxu1 }
 0x195   :  { %297 = shalt.err (!%p294_p4)
}
 0x196   :  { %215 = dma.vmem_to_hbm [thread:$0]  %s213_s18, 128, %s388_s5, [#allocation3]   ;;  %v272_v26 = vpop.f32.mrf.mxu1 }
 0x197   :  { %306 = dma.done.wait [#allocation3], 128  }
 0x198   :  { %307 = vsyncadd [#allocation3], 4294967168 }
 0x199   :  { %219 = vsyncpa [#allocation3], 1 }

</bundles_post_ra>
